<compile_context>
chip_gen: v7x
topology: tpu7x:2x2x1
jax: 0.10.0
libtpu: 0.0.40
codegen_flags: <defaults>
</compile_context>

<pallas_src>
import jax
import jax.numpy as jnp
from jax.experimental import pallas as pl
from jax.experimental.pallas import tpu as pltpu

EPS = 1e-5  # PyTorch BatchNorm1d default

# Column indices inside the packed per-channel parameter array (co, _NUM_VEC).
_VC_BIAS_K1, _VC_BIAS_K3, _VC_B2B, _VC_B3B = 0, 1, 2, 3
_VC_G2, _VC_BE2, _VC_G3, _VC_BE3, _VC_GA, _VC_BEA = 4, 5, 6, 7, 8, 9
_NUM_VEC = 10


def _make_kernel(N, L, co4, NLp):
    NL = N * L
    inv_n = 1.0 / float(NL)

    def kernel(x_ref, wk1_ref, wk3_ref, w2b_ref, w3b_ref, vec_ref, out_ref):
        x = x_ref[...]          # (cin, NLp) f32, zero-padded lanes
        vec = vec_ref[...]      # (co, _NUM_VEC) f32

        lane = jax.lax.broadcasted_iota(jnp.int32, (1, NLp), 1)
        pos = lane % L          # position within its length-L sequence
        is_real = lane < NL     # non-padded lanes
        valid_f = is_real.astype(jnp.float32)

        def im2col(a, K):
            # Stack the K shifted copies of `a` along the channel (sublane)
            # axis: block k holds a[:, i + (k - P)] with zeros wherever the
            # source falls outside the same sequence (Conv1d "same" padding)
            # or outside the real (non-padded) lanes.
            P = (K - 1) // 2
            C = a.shape[0]
            zpad = jnp.zeros((C, P), a.dtype)
            apad = jnp.concatenate([zpad, a, zpad], axis=1)   # (C, NLp + 2P)
            blocks = []
            for k in range(K):
                s = k - P
                blk = apad[:, k:k + NLp]                      # a shifted by s
                ok = is_real & (pos + s >= 0) & (pos + s < L)
                blocks.append(jnp.where(ok, blk, 0.0))
            return jnp.concatenate(blocks, axis=0)            # (K*C, NLp)

        def dot(w_ref, a):
            # bf16 MXU inputs, f32 accumulation.
            return jnp.dot(w_ref[...], a.astype(jnp.bfloat16),
                           preferred_element_type=jnp.float32)

        def bn_relu(y, g, b):
            # Training-mode BatchNorm1d over the NL valid lanes + ReLU.
            mean = jnp.sum(y * valid_f, axis=1, keepdims=True) * inv_n
            d = (y - mean) * valid_f
            var = jnp.sum(d * d, axis=1, keepdims=True) * inv_n
            z = g * (y - mean) * jax.lax.rsqrt(var + EPS) + b
            return jnp.maximum(z, 0.0)

        # ---- fused convs reading x directly --------------------------------
        # kernel-1 convs (branch1.conv1 + branch2.conv1) in one matmul
        y1 = dot(wk1_ref, x) + vec[0:2 * co4, _VC_BIAS_K1:_VC_BIAS_K1 + 1]
        # kernel-3 convs (branch3.conv1 + branch4.conv3) in one matmul
        y34 = dot(wk3_ref, im2col(x, 3)) + vec[0:2 * co4, _VC_BIAS_K3:_VC_BIAS_K3 + 1]

        br1 = y1[0:co4]            # branch1
        pre2 = y1[co4:2 * co4]     # branch2 pre-BN
        pre3 = y34[0:co4]          # branch3 pre-BN
        br4 = y34[co4:2 * co4]     # branch4

        # ---- branch2: BN + ReLU + conv3 ------------------------------------
        t2 = bn_relu(pre2, vec[0:co4, _VC_G2:_VC_G2 + 1],
                     vec[0:co4, _VC_BE2:_VC_BE2 + 1])
        br2 = dot(w2b_ref, im2col(t2, 3)) + vec[0:co4, _VC_B2B:_VC_B2B + 1]

        # ---- branch3: BN + ReLU + conv5 ------------------------------------
        t3 = bn_relu(pre3, vec[0:co4, _VC_G3:_VC_G3 + 1],
                     vec[0:co4, _VC_BE3:_VC_BE3 + 1])
        br3 = dot(w3b_ref, im2col(t3, 5)) + vec[0:co4, _VC_B3B:_VC_B3B + 1]

        # ---- activa: BN(co) + ReLU on the channel concat, one dense store --
        cat = jnp.concatenate([br1, br2, br3, br4], axis=0)   # (co, NLp)
        out = bn_relu(cat, vec[:, _VC_GA:_VC_GA + 1], vec[:, _VC_BEA:_VC_BEA + 1])
        out_ref[...] = out.astype(out_ref.dtype)

    return kernel


def inception_pallas(x_ncl, p):
    """x_ncl: (N, cin, L) float32 (PyTorch Conv1d layout). Returns (N, co, L)."""
    N, cin, L = x_ncl.shape
    co = p["gA"].shape[0]
    assert co % 4 == 0
    co4 = co // 4
    NL = N * L
    NLp = ((NL + 127) // 128) * 128   # pad lanes to a multiple of 128

    # (N, cin, L) -> (cin, N*L); channels on sublanes, N*L on lanes.
    xT = jnp.transpose(x_ncl, (1, 0, 2)).reshape(cin, NL).astype(jnp.float32)
    xT = jnp.pad(xT, ((0, 0), (0, NLp - NL)))

    def w_cat(w):
        # torch (Cout, Cin, K) -> (Cout, K*Cin) matching the im2col ordering;
        # bf16 for the MXU.
        Cout, Cin, K = w.shape
        return jnp.transpose(w, (0, 2, 1)).reshape(Cout, K * Cin).astype(jnp.bfloat16)

    wk1 = jnp.concatenate([w_cat(p["w1"]), w_cat(p["w2a"])], axis=0)   # (2*co4, cin)
    wk3 = jnp.concatenate([w_cat(p["w3a"]), w_cat(p["w4"])], axis=0)   # (2*co4, 3*cin)
    w2b = w_cat(p["w2b"])                                              # (co4, 3*co4)
    w3b = w_cat(p["w3b"])                                              # (co4, 5*co4)

    # Pack all per-channel vectors (biases, BN gamma/beta) into one array.
    def col(v):
        v = jnp.asarray(v, jnp.float32).reshape(-1)
        return jnp.pad(v, (0, co - v.shape[0]))[:, None]

    vec = jnp.concatenate([
        col(jnp.concatenate([p["b1"], p["b2a"]])),    # _VC_BIAS_K1
        col(jnp.concatenate([p["b3a"], p["b4"]])),    # _VC_BIAS_K3
        col(p["b2b"]), col(p["b3b"]),                 # _VC_B2B, _VC_B3B
        col(p["g2"]), col(p["be2"]),                  # _VC_G2, _VC_BE2
        col(p["g3"]), col(p["be3"]),                  # _VC_G3, _VC_BE3
        col(p["gA"]), col(p["beA"]),                  # _VC_GA, _VC_BEA
    ], axis=1)                                        # (co, _NUM_VEC)

    kernel = _make_kernel(N, L, co4, NLp)

    # TODO(synk): for very large N*L, add a row-tiled grid with two-pass BN
    # (sum/sum-sq scratch) so the kernel pipelines HBM<->VMEM and shards over
    # v7x's two TensorCores; at CNNText-scale shapes everything fits in VMEM.
    out2 = pl.pallas_call(
        kernel,
        out_shape=jax.ShapeDtypeStruct((co, NLp), jnp.float32),
        in_specs=[pl.BlockSpec(memory_space=pltpu.MemorySpace.VMEM)] * 6,
        out_specs=pl.BlockSpec(memory_space=pltpu.MemorySpace.VMEM),
    )(xT, wk1, wk3, w2b, w3b, vec)

    # (co, NLp) -> (N, co, L) to match PyTorch output layout.
    return jnp.transpose(out2[:, :NL].reshape(co, N, L), (1, 0, 2))


# ---------------- pure-JAX reference (for a correctness check) ----------------
def _conv1d_ref(x, w, b):
    K = w.shape[2]
    P = (K - 1) // 2
    y = jax.lax.conv_general_dilated(
        x, w, window_strides=(1,), padding=[(P, P)],
        dimension_numbers=("NCH", "OIH", "NCH"),
        precision=jax.lax.Precision.HIGHEST)
    return y + b[None, :, None]


def _bn_ref(x, g, b):
    mean = jnp.mean(x, axis=(0, 2), keepdims=True)
    var = jnp.mean((x - mean) ** 2, axis=(0, 2), keepdims=True)
    return g[None, :, None] * (x - mean) * jax.lax.rsqrt(var + EPS) + b[None, :, None]


def inception_ref(x, p):
    b1 = _conv1d_ref(x, p["w1"], p["b1"])
    t2 = jnp.maximum(_bn_ref(_conv1d_ref(x, p["w2a"], p["b2a"]), p["g2"], p["be2"]), 0.0)
    b2 = _conv1d_ref(t2, p["w2b"], p["b2b"])
    t3 = jnp.maximum(_bn_ref(_conv1d_ref(x, p["w3a"], p["b3a"]), p["g3"], p["be3"]), 0.0)
    b3 = _conv1d_ref(t3, p["w3b"], p["b3b"])
    b4 = _conv1d_ref(x, p["w4"], p["b4"])
    cat = jnp.concatenate([b1, b2, b3, b4], axis=1)
    return jnp.maximum(_bn_ref(cat, p["gA"], p["beA"]), 0.0)


def make_params(key, cin, co):
    co4 = co // 4
    ks = jax.random.split(key, 32)
    i = iter(range(32))

    def rnd(shape, scale=0.2):
        return scale * jax.random.normal(ks[next(i)], shape, jnp.float32)

    return {
        # branch1
        "w1": rnd((co4, cin, 1)), "b1": rnd((co4,)),
        # branch2
        "w2a": rnd((co4, cin, 1)), "b2a": rnd((co4,)),
        "g2": 1.0 + rnd((co4,), 0.1), "be2": rnd((co4,), 0.1),
        "w2b": rnd((co4, co4, 3)), "b2b": rnd((co4,)),
        # branch3
        "w3a": rnd((co4, cin, 3)), "b3a": rnd((co4,)),
        "g3": 1.0 + rnd((co4,), 0.1), "be3": rnd((co4,), 0.1),
        "w3b": rnd((co4, co4, 5)), "b3b": rnd((co4,)),
        # branch4
        "w4": rnd((co4, cin, 3)), "b4": rnd((co4,)),
        # activa BN(co)
        "gA": 1.0 + rnd((co,), 0.1), "beA": rnd((co,), 0.1),
    }


if __name__ == "__main__":
    # small shapes consistent with the module: x is (batch, cin, seq_len)
    N, cin, L, co = 2, 4, 16, 8
    key = jax.random.PRNGKey(0)
    kx, kp = jax.random.split(key)
    x = jax.random.normal(kx, (N, cin, L), jnp.float32)
    params = make_params(kp, cin, co)

    out = jax.block_until_ready(inception_pallas(x, params))
    ref = jax.block_until_ready(inception_ref(x, params))

    assert out.shape == (N, co, L) and out.dtype == jnp.float32
    max_err = float(jnp.max(jnp.abs(out - ref)))
    mean_err = float(jnp.mean(jnp.abs(out - ref)))
    # Pointwise tolerance sized for bf16 MXU inputs (f32 accumulation) vs the
    # f32 HIGHEST-precision reference (BN normalization amplifies bf16 rounding
    # noise); the aggregate (mean) check is much tighter.
    assert jnp.allclose(out, ref, atol=5e-2, rtol=5e-2), f"max abs diff {max_err}"
    assert mean_err < 1e-2, f"mean abs diff {mean_err}"
    print("KERNEL_OK")
</pallas_src>

<mosaic_0001>
module attributes {stable_mosaic.version = 11 : i64} {
  func.func @kernel(%arg0: memref<4x128xf32, #tpu.memory_space<vmem>>, %arg1: memref<4x4xbf16, #tpu.memory_space<vmem>>, %arg2: memref<4x12xbf16, #tpu.memory_space<vmem>>, %arg3: memref<2x6xbf16, #tpu.memory_space<vmem>>, %arg4: memref<2x10xbf16, #tpu.memory_space<vmem>>, %arg5: memref<8x10xf32, #tpu.memory_space<vmem>>, %arg6: memref<8x128xf32, #tpu.memory_space<vmem>>) attributes {dimension_semantics = [], scalar_prefetch = 0 : i64, scratch_operands = 0 : i64, tpu.core_type = #tpu.core_type<tc>} {
    %c0 = arith.constant 0 : index
    %c0_0 = arith.constant 0 : index
    %0 = vector.load %arg0[%c0, %c0_0] : memref<4x128xf32, #tpu.memory_space<vmem>>, vector<4x128xf32>
    %c0_1 = arith.constant 0 : index
    %c0_2 = arith.constant 0 : index
    %1 = vector.load %arg5[%c0_1, %c0_2] : memref<8x10xf32, #tpu.memory_space<vmem>>, vector<8x10xf32>
    %2 = tpu.iota {dimensions = array<i32: 1>} : vector<1x128xi32>
    %c16_i32 = arith.constant 16 : i32
    %c0_i32 = arith.constant 0 : i32
    %3 = arith.cmpi eq, %c16_i32, %c0_i32 : i32
    %c1_i32 = arith.constant 1 : i32
    %4 = arith.select %3, %c1_i32, %c16_i32 : i32
    %5 = vector.broadcast %4 : i32 to vector<1x128xi32>
    %6 = arith.remsi %2, %5 : vector<1x128xi32>
    %c0_i32_3 = arith.constant 0 : i32
    %7 = vector.broadcast %c0_i32_3 : i32 to vector<1x128xi32>
    %8 = arith.cmpi ne, %6, %7 : vector<1x128xi32>
    %c0_i32_4 = arith.constant 0 : i32
    %9 = vector.broadcast %c0_i32_4 : i32 to vector<1x128xi32>
    %10 = arith.cmpi slt, %6, %9 : vector<1x128xi32>
    %c0_i32_5 = arith.constant 0 : i32
    %11 = arith.cmpi slt, %4, %c0_i32_5 : i32
    %12 = vector.broadcast %11 : i1 to vector<1x128xi1>
    %13 = vector.broadcast %12 : vector<1x128xi1> to vector<1x128xi1>
    %14 = arith.xori %10, %13 : vector<1x128xi1>
    %15 = arith.andi %14, %8 : vector<1x128xi1>
    %16 = vector.broadcast %4 : i32 to vector<1x128xi32>
    %17 = arith.addi %6, %16 : vector<1x128xi32>
    %18 = arith.select %15, %17, %6 : vector<1x128xi1>, vector<1x128xi32>
    %c32_i32 = arith.constant 32 : i32
    %19 = vector.broadcast %c32_i32 : i32 to vector<1x128xi32>
    %20 = arith.cmpi slt, %2, %19 : vector<1x128xi32>
    %21 = arith.extui %20 : vector<1x128xi1> to vector<1x128xi32>
    %22 = arith.sitofp %21 : vector<1x128xi32> to vector<1x128xf32>
    %c0_6 = arith.constant 0 : index
    %c0_7 = arith.constant 0 : index
    %23 = vector.load %arg1[%c0_6, %c0_7] : memref<4x4xbf16, #tpu.memory_space<vmem>>, vector<4x4xbf16>
    %24 = arith.truncf %0 : vector<4x128xf32> to vector<4x128xbf16>
    %cst = arith.constant dense<0.000000e+00> : vector<4x128xf32>
    %25 = tpu.matmul %23, %24, %cst {dimension_numbers = #tpu.dot_dimension_numbers<[1], [0], [0], [1], [0, 0, 1, 1], [], []>} : vector<4x4xbf16>, vector<4x128xbf16>, vector<4x128xf32> -> vector<4x128xf32>
    %26 = vector.extract_strided_slice %1 {offsets = [0, 0], sizes = [4, 1], strides = [1, 1]} : vector<8x10xf32> to vector<4x1xf32>
    %27 = vector.broadcast %26 : vector<4x1xf32> to vector<4x128xf32>
    %28 = arith.addf %25, %27 : vector<4x128xf32>
    %cst_8 = arith.constant 0.000000e+00 : f32
    %29 = vector.broadcast %cst_8 : f32 to vector<4x1xf32>
    %30 = tpu.concatenate %29, %0, %29 in 1 : vector<4x1xf32>, vector<4x128xf32>, vector<4x1xf32> -> vector<4x130xf32>
    %31 = vector.extract_strided_slice %30 {offsets = [0, 0], sizes = [4, 128], strides = [1, 1]} : vector<4x130xf32> to vector<4x128xf32>
    %c-1_i32 = arith.constant -1 : i32
    %32 = vector.broadcast %c-1_i32 : i32 to vector<1x128xi32>
    %33 = arith.addi %18, %32 : vector<1x128xi32>
    %c0_i32_9 = arith.constant 0 : i32
    %34 = vector.broadcast %c0_i32_9 : i32 to vector<1x128xi32>
    %35 = arith.cmpi sge, %33, %34 : vector<1x128xi32>
    %36 = arith.andi %20, %35 : vector<1x128xi1>
    %c-1_i32_10 = arith.constant -1 : i32
    %37 = vector.broadcast %c-1_i32_10 : i32 to vector<1x128xi32>
    %38 = arith.addi %18, %37 : vector<1x128xi32>
    %c16_i32_11 = arith.constant 16 : i32
    %39 = vector.broadcast %c16_i32_11 : i32 to vector<1x128xi32>
    %40 = arith.cmpi slt, %38, %39 : vector<1x128xi32>
    %41 = arith.andi %36, %40 : vector<1x128xi1>
    %cst_12 = arith.constant 0.000000e+00 : f32
    %42 = vector.shape_cast %41 : vector<1x128xi1> to vector<1x128xi1>
    %43 = vector.broadcast %42 : vector<1x128xi1> to vector<4x128xi1>
    %44 = vector.broadcast %cst_12 : f32 to vector<4x128xf32>
    %45 = arith.select %43, %31, %44 : vector<4x128xi1>, vector<4x128xf32>
    %46 = vector.extract_strided_slice %30 {offsets = [0, 1], sizes = [4, 128], strides = [1, 1]} : vector<4x130xf32> to vector<4x128xf32>
    %c0_i32_13 = arith.constant 0 : i32
    %47 = vector.broadcast %c0_i32_13 : i32 to vector<1x128xi32>
    %48 = arith.addi %18, %47 : vector<1x128xi32>
    %c0_i32_14 = arith.constant 0 : i32
    %49 = vector.broadcast %c0_i32_14 : i32 to vector<1x128xi32>
    %50 = arith.cmpi sge, %48, %49 : vector<1x128xi32>
    %51 = arith.andi %20, %50 : vector<1x128xi1>
    %c0_i32_15 = arith.constant 0 : i32
    %52 = vector.broadcast %c0_i32_15 : i32 to vector<1x128xi32>
    %53 = arith.addi %18, %52 : vector<1x128xi32>
    %c16_i32_16 = arith.constant 16 : i32
    %54 = vector.broadcast %c16_i32_16 : i32 to vector<1x128xi32>
    %55 = arith.cmpi slt, %53, %54 : vector<1x128xi32>
    %56 = arith.andi %51, %55 : vector<1x128xi1>
    %cst_17 = arith.constant 0.000000e+00 : f32
    %57 = vector.shape_cast %56 : vector<1x128xi1> to vector<1x128xi1>
    %58 = vector.broadcast %57 : vector<1x128xi1> to vector<4x128xi1>
    %59 = vector.broadcast %cst_17 : f32 to vector<4x128xf32>
    %60 = arith.select %58, %46, %59 : vector<4x128xi1>, vector<4x128xf32>
    %61 = vector.extract_strided_slice %30 {offsets = [0, 2], sizes = [4, 128], strides = [1, 1]} : vector<4x130xf32> to vector<4x128xf32>
    %c1_i32_18 = arith.constant 1 : i32
    %62 = vector.broadcast %c1_i32_18 : i32 to vector<1x128xi32>
    %63 = arith.addi %18, %62 : vector<1x128xi32>
    %c0_i32_19 = arith.constant 0 : i32
    %64 = vector.broadcast %c0_i32_19 : i32 to vector<1x128xi32>
    %65 = arith.cmpi sge, %63, %64 : vector<1x128xi32>
    %66 = arith.andi %20, %65 : vector<1x128xi1>
    %c1_i32_20 = arith.constant 1 : i32
    %67 = vector.broadcast %c1_i32_20 : i32 to vector<1x128xi32>
    %68 = arith.addi %18, %67 : vector<1x128xi32>
    %c16_i32_21 = arith.constant 16 : i32
    %69 = vector.broadcast %c16_i32_21 : i32 to vector<1x128xi32>
    %70 = arith.cmpi slt, %68, %69 : vector<1x128xi32>
    %71 = arith.andi %66, %70 : vector<1x128xi1>
    %cst_22 = arith.constant 0.000000e+00 : f32
    %72 = vector.shape_cast %71 : vector<1x128xi1> to vector<1x128xi1>
    %73 = vector.broadcast %72 : vector<1x128xi1> to vector<4x128xi1>
    %74 = vector.broadcast %cst_22 : f32 to vector<4x128xf32>
    %75 = arith.select %73, %61, %74 : vector<4x128xi1>, vector<4x128xf32>
    %76 = tpu.concatenate %45, %60, %75 in 0 : vector<4x128xf32>, vector<4x128xf32>, vector<4x128xf32> -> vector<12x128xf32>
    %c0_23 = arith.constant 0 : index
    %c0_24 = arith.constant 0 : index
    %77 = vector.load %arg2[%c0_23, %c0_24] : memref<4x12xbf16, #tpu.memory_space<vmem>>, vector<4x12xbf16>
    %78 = arith.truncf %76 : vector<12x128xf32> to vector<12x128xbf16>
    %cst_25 = arith.constant dense<0.000000e+00> : vector<4x128xf32>
    %79 = tpu.matmul %77, %78, %cst_25 {dimension_numbers = #tpu.dot_dimension_numbers<[1], [0], [0], [1], [0, 0, 1, 1], [], []>} : vector<4x12xbf16>, vector<12x128xbf16>, vector<4x128xf32> -> vector<4x128xf32>
    %80 = vector.extract_strided_slice %1 {offsets = [0, 1], sizes = [4, 1], strides = [1, 1]} : vector<8x10xf32> to vector<4x1xf32>
    %81 = vector.broadcast %80 : vector<4x1xf32> to vector<4x128xf32>
    %82 = arith.addf %79, %81 : vector<4x128xf32>
    %83 = vector.extract_strided_slice %28 {offsets = [0, 0], sizes = [2, 128], strides = [1, 1]} : vector<4x128xf32> to vector<2x128xf32>
    %84 = vector.extract_strided_slice %28 {offsets = [2, 0], sizes = [2, 128], strides = [1, 1]} : vector<4x128xf32> to vector<2x128xf32>
    %85 = vector.extract_strided_slice %82 {offsets = [0, 0], sizes = [2, 128], strides = [1, 1]} : vector<4x128xf32> to vector<2x128xf32>
    %86 = vector.extract_strided_slice %82 {offsets = [2, 0], sizes = [2, 128], strides = [1, 1]} : vector<4x128xf32> to vector<2x128xf32>
    %87 = vector.extract_strided_slice %1 {offsets = [0, 4], sizes = [2, 1], strides = [1, 1]} : vector<8x10xf32> to vector<2x1xf32>
    %88 = vector.extract_strided_slice %1 {offsets = [0, 5], sizes = [2, 1], strides = [1, 1]} : vector<8x10xf32> to vector<2x1xf32>
    %89 = vector.broadcast %22 : vector<1x128xf32> to vector<2x128xf32>
    %90 = arith.mulf %84, %89 : vector<2x128xf32>
    %cst_26 = arith.constant dense<0.000000e+00> : vector<2xf32>
    %91 = vector.multi_reduction <add>, %90, %cst_26 [1] : vector<2x128xf32> to vector<2xf32>
    %92 = vector.shape_cast %91 : vector<2xf32> to vector<2x1xf32>
    %cst_27 = arith.constant 3.125000e-02 : f32
    %93 = vector.broadcast %cst_27 : f32 to vector<2x1xf32>
    %94 = arith.mulf %92, %93 : vector<2x1xf32>
    %95 = vector.broadcast %94 : vector<2x1xf32> to vector<2x128xf32>
    %96 = arith.subf %84, %95 : vector<2x128xf32>
    %97 = vector.broadcast %22 : vector<1x128xf32> to vector<2x128xf32>
    %98 = arith.mulf %96, %97 : vector<2x128xf32>
    %99 = arith.mulf %98, %98 : vector<2x128xf32>
    %cst_28 = arith.constant dense<0.000000e+00> : vector<2xf32>
    %100 = vector.multi_reduction <add>, %99, %cst_28 [1] : vector<2x128xf32> to vector<2xf32>
    %101 = vector.shape_cast %100 : vector<2xf32> to vector<2x1xf32>
    %cst_29 = arith.constant 3.125000e-02 : f32
    %102 = vector.broadcast %cst_29 : f32 to vector<2x1xf32>
    %103 = arith.mulf %101, %102 : vector<2x1xf32>
    %104 = vector.broadcast %94 : vector<2x1xf32> to vector<2x128xf32>
    %105 = arith.subf %84, %104 : vector<2x128xf32>
    %106 = vector.broadcast %87 : vector<2x1xf32> to vector<2x128xf32>
    %107 = arith.mulf %106, %105 : vector<2x128xf32>
    %cst_30 = arith.constant 9.99999974E-6 : f32
    %108 = vector.broadcast %cst_30 : f32 to vector<2x1xf32>
    %109 = arith.addf %103, %108 : vector<2x1xf32>
    %110 = math.rsqrt %109 : vector<2x1xf32>
    %111 = vector.broadcast %110 : vector<2x1xf32> to vector<2x128xf32>
    %112 = arith.mulf %107, %111 : vector<2x128xf32>
    %113 = vector.broadcast %88 : vector<2x1xf32> to vector<2x128xf32>
    %114 = arith.addf %112, %113 : vector<2x128xf32>
    %cst_31 = arith.constant 0.000000e+00 : f32
    %115 = vector.broadcast %cst_31 : f32 to vector<2x128xf32>
    %116 = arith.maximumf %114, %115 : vector<2x128xf32>
    %cst_32 = arith.constant 0.000000e+00 : f32
    %117 = vector.broadcast %cst_32 : f32 to vector<2x1xf32>
    %118 = tpu.concatenate %117, %116, %117 in 1 : vector<2x1xf32>, vector<2x128xf32>, vector<2x1xf32> -> vector<2x130xf32>
    %119 = vector.extract_strided_slice %118 {offsets = [0, 0], sizes = [2, 128], strides = [1, 1]} : vector<2x130xf32> to vector<2x128xf32>
    %c-1_i32_33 = arith.constant -1 : i32
    %120 = vector.broadcast %c-1_i32_33 : i32 to vector<1x128xi32>
    %121 = arith.addi %18, %120 : vector<1x128xi32>
    %c0_i32_34 = arith.constant 0 : i32
    %122 = vector.broadcast %c0_i32_34 : i32 to vector<1x128xi32>
    %123 = arith.cmpi sge, %121, %122 : vector<1x128xi32>
    %124 = arith.andi %20, %123 : vector<1x128xi1>
    %c-1_i32_35 = arith.constant -1 : i32
    %125 = vector.broadcast %c-1_i32_35 : i32 to vector<1x128xi32>
    %126 = arith.addi %18, %125 : vector<1x128xi32>
    %c16_i32_36 = arith.constant 16 : i32
    %127 = vector.broadcast %c16_i32_36 : i32 to vector<1x128xi32>
    %128 = arith.cmpi slt, %126, %127 : vector<1x128xi32>
    %129 = arith.andi %124, %128 : vector<1x128xi1>
    %cst_37 = arith.constant 0.000000e+00 : f32
    %130 = vector.shape_cast %129 : vector<1x128xi1> to vector<1x128xi1>
    %131 = vector.broadcast %130 : vector<1x128xi1> to vector<2x128xi1>
    %132 = vector.broadcast %cst_37 : f32 to vector<2x128xf32>
    %133 = arith.select %131, %119, %132 : vector<2x128xi1>, vector<2x128xf32>
    %134 = vector.extract_strided_slice %118 {offsets = [0, 1], sizes = [2, 128], strides = [1, 1]} : vector<2x130xf32> to vector<2x128xf32>
    %c0_i32_38 = arith.constant 0 : i32
    %135 = vector.broadcast %c0_i32_38 : i32 to vector<1x128xi32>
    %136 = arith.addi %18, %135 : vector<1x128xi32>
    %c0_i32_39 = arith.constant 0 : i32
    %137 = vector.broadcast %c0_i32_39 : i32 to vector<1x128xi32>
    %138 = arith.cmpi sge, %136, %137 : vector<1x128xi32>
    %139 = arith.andi %20, %138 : vector<1x128xi1>
    %c0_i32_40 = arith.constant 0 : i32
    %140 = vector.broadcast %c0_i32_40 : i32 to vector<1x128xi32>
    %141 = arith.addi %18, %140 : vector<1x128xi32>
    %c16_i32_41 = arith.constant 16 : i32
    %142 = vector.broadcast %c16_i32_41 : i32 to vector<1x128xi32>
    %143 = arith.cmpi slt, %141, %142 : vector<1x128xi32>
    %144 = arith.andi %139, %143 : vector<1x128xi1>
    %cst_42 = arith.constant 0.000000e+00 : f32
    %145 = vector.shape_cast %144 : vector<1x128xi1> to vector<1x128xi1>
    %146 = vector.broadcast %145 : vector<1x128xi1> to vector<2x128xi1>
    %147 = vector.broadcast %cst_42 : f32 to vector<2x128xf32>
    %148 = arith.select %146, %134, %147 : vector<2x128xi1>, vector<2x128xf32>
    %149 = vector.extract_strided_slice %118 {offsets = [0, 2], sizes = [2, 128], strides = [1, 1]} : vector<2x130xf32> to vector<2x128xf32>
    %c1_i32_43 = arith.constant 1 : i32
    %150 = vector.broadcast %c1_i32_43 : i32 to vector<1x128xi32>
    %151 = arith.addi %18, %150 : vector<1x128xi32>
    %c0_i32_44 = arith.constant 0 : i32
    %152 = vector.broadcast %c0_i32_44 : i32 to vector<1x128xi32>
    %153 = arith.cmpi sge, %151, %152 : vector<1x128xi32>
    %154 = arith.andi %20, %153 : vector<1x128xi1>
    %c1_i32_45 = arith.constant 1 : i32
    %155 = vector.broadcast %c1_i32_45 : i32 to vector<1x128xi32>
    %156 = arith.addi %18, %155 : vector<1x128xi32>
    %c16_i32_46 = arith.constant 16 : i32
    %157 = vector.broadcast %c16_i32_46 : i32 to vector<1x128xi32>
    %158 = arith.cmpi slt, %156, %157 : vector<1x128xi32>
    %159 = arith.andi %154, %158 : vector<1x128xi1>
    %cst_47 = arith.constant 0.000000e+00 : f32
    %160 = vector.shape_cast %159 : vector<1x128xi1> to vector<1x128xi1>
    %161 = vector.broadcast %160 : vector<1x128xi1> to vector<2x128xi1>
    %162 = vector.broadcast %cst_47 : f32 to vector<2x128xf32>
    %163 = arith.select %161, %149, %162 : vector<2x128xi1>, vector<2x128xf32>
    %164 = tpu.concatenate %133, %148, %163 in 0 : vector<2x128xf32>, vector<2x128xf32>, vector<2x128xf32> -> vector<6x128xf32>
    %c0_48 = arith.constant 0 : index
    %c0_49 = arith.constant 0 : index
    %165 = vector.load %arg3[%c0_48, %c0_49] : memref<2x6xbf16, #tpu.memory_space<vmem>>, vector<2x6xbf16>
    %166 = arith.truncf %164 : vector<6x128xf32> to vector<6x128xbf16>
    %cst_50 = arith.constant dense<0.000000e+00> : vector<2x128xf32>
    %167 = tpu.matmul %165, %166, %cst_50 {dimension_numbers = #tpu.dot_dimension_numbers<[1], [0], [0], [1], [0, 0, 1, 1], [], []>} : vector<2x6xbf16>, vector<6x128xbf16>, vector<2x128xf32> -> vector<2x128xf32>
    %168 = vector.extract_strided_slice %1 {offsets = [0, 2], sizes = [2, 1], strides = [1, 1]} : vector<8x10xf32> to vector<2x1xf32>
    %169 = vector.broadcast %168 : vector<2x1xf32> to vector<2x128xf32>
    %170 = arith.addf %167, %169 : vector<2x128xf32>
    %171 = vector.extract_strided_slice %1 {offsets = [0, 6], sizes = [2, 1], strides = [1, 1]} : vector<8x10xf32> to vector<2x1xf32>
    %172 = vector.extract_strided_slice %1 {offsets = [0, 7], sizes = [2, 1], strides = [1, 1]} : vector<8x10xf32> to vector<2x1xf32>
    %173 = vector.broadcast %22 : vector<1x128xf32> to vector<2x128xf32>
    %174 = arith.mulf %85, %173 : vector<2x128xf32>
    %cst_51 = arith.constant dense<0.000000e+00> : vector<2xf32>
    %175 = vector.multi_reduction <add>, %174, %cst_51 [1] : vector<2x128xf32> to vector<2xf32>
    %176 = vector.shape_cast %175 : vector<2xf32> to vector<2x1xf32>
    %cst_52 = arith.constant 3.125000e-02 : f32
    %177 = vector.broadcast %cst_52 : f32 to vector<2x1xf32>
    %178 = arith.mulf %176, %177 : vector<2x1xf32>
    %179 = vector.broadcast %178 : vector<2x1xf32> to vector<2x128xf32>
    %180 = arith.subf %85, %179 : vector<2x128xf32>
    %181 = vector.broadcast %22 : vector<1x128xf32> to vector<2x128xf32>
    %182 = arith.mulf %180, %181 : vector<2x128xf32>
    %183 = arith.mulf %182, %182 : vector<2x128xf32>
    %cst_53 = arith.constant dense<0.000000e+00> : vector<2xf32>
    %184 = vector.multi_reduction <add>, %183, %cst_53 [1] : vector<2x128xf32> to vector<2xf32>
    %185 = vector.shape_cast %184 : vector<2xf32> to vector<2x1xf32>
    %cst_54 = arith.constant 3.125000e-02 : f32
    %186 = vector.broadcast %cst_54 : f32 to vector<2x1xf32>
    %187 = arith.mulf %185, %186 : vector<2x1xf32>
    %188 = vector.broadcast %178 : vector<2x1xf32> to vector<2x128xf32>
    %189 = arith.subf %85, %188 : vector<2x128xf32>
    %190 = vector.broadcast %171 : vector<2x1xf32> to vector<2x128xf32>
    %191 = arith.mulf %190, %189 : vector<2x128xf32>
    %cst_55 = arith.constant 9.99999974E-6 : f32
    %192 = vector.broadcast %cst_55 : f32 to vector<2x1xf32>
    %193 = arith.addf %187, %192 : vector<2x1xf32>
    %194 = math.rsqrt %193 : vector<2x1xf32>
    %195 = vector.broadcast %194 : vector<2x1xf32> to vector<2x128xf32>
    %196 = arith.mulf %191, %195 : vector<2x128xf32>
    %197 = vector.broadcast %172 : vector<2x1xf32> to vector<2x128xf32>
    %198 = arith.addf %196, %197 : vector<2x128xf32>
    %cst_56 = arith.constant 0.000000e+00 : f32
    %199 = vector.broadcast %cst_56 : f32 to vector<2x128xf32>
    %200 = arith.maximumf %198, %199 : vector<2x128xf32>
    %cst_57 = arith.constant 0.000000e+00 : f32
    %201 = vector.broadcast %cst_57 : f32 to vector<2x2xf32>
    %202 = tpu.concatenate %201, %200, %201 in 1 : vector<2x2xf32>, vector<2x128xf32>, vector<2x2xf32> -> vector<2x132xf32>
    %203 = vector.extract_strided_slice %202 {offsets = [0, 0], sizes = [2, 128], strides = [1, 1]} : vector<2x132xf32> to vector<2x128xf32>
    %c-2_i32 = arith.constant -2 : i32
    %204 = vector.broadcast %c-2_i32 : i32 to vector<1x128xi32>
    %205 = arith.addi %18, %204 : vector<1x128xi32>
    %c0_i32_58 = arith.constant 0 : i32
    %206 = vector.broadcast %c0_i32_58 : i32 to vector<1x128xi32>
    %207 = arith.cmpi sge, %205, %206 : vector<1x128xi32>
    %208 = arith.andi %20, %207 : vector<1x128xi1>
    %c-2_i32_59 = arith.constant -2 : i32
    %209 = vector.broadcast %c-2_i32_59 : i32 to vector<1x128xi32>
    %210 = arith.addi %18, %209 : vector<1x128xi32>
    %c16_i32_60 = arith.constant 16 : i32
    %211 = vector.broadcast %c16_i32_60 : i32 to vector<1x128xi32>
    %212 = arith.cmpi slt, %210, %211 : vector<1x128xi32>
    %213 = arith.andi %208, %212 : vector<1x128xi1>
    %cst_61 = arith.constant 0.000000e+00 : f32
    %214 = vector.shape_cast %213 : vector<1x128xi1> to vector<1x128xi1>
    %215 = vector.broadcast %214 : vector<1x128xi1> to vector<2x128xi1>
    %216 = vector.broadcast %cst_61 : f32 to vector<2x128xf32>
    %217 = arith.select %215, %203, %216 : vector<2x128xi1>, vector<2x128xf32>
    %218 = vector.extract_strided_slice %202 {offsets = [0, 1], sizes = [2, 128], strides = [1, 1]} : vector<2x132xf32> to vector<2x128xf32>
    %c-1_i32_62 = arith.constant -1 : i32
    %219 = vector.broadcast %c-1_i32_62 : i32 to vector<1x128xi32>
    %220 = arith.addi %18, %219 : vector<1x128xi32>
    %c0_i32_63 = arith.constant 0 : i32
    %221 = vector.broadcast %c0_i32_63 : i32 to vector<1x128xi32>
    %222 = arith.cmpi sge, %220, %221 : vector<1x128xi32>
    %223 = arith.andi %20, %222 : vector<1x128xi1>
    %c-1_i32_64 = arith.constant -1 : i32
    %224 = vector.broadcast %c-1_i32_64 : i32 to vector<1x128xi32>
    %225 = arith.addi %18, %224 : vector<1x128xi32>
    %c16_i32_65 = arith.constant 16 : i32
    %226 = vector.broadcast %c16_i32_65 : i32 to vector<1x128xi32>
    %227 = arith.cmpi slt, %225, %226 : vector<1x128xi32>
    %228 = arith.andi %223, %227 : vector<1x128xi1>
    %cst_66 = arith.constant 0.000000e+00 : f32
    %229 = vector.shape_cast %228 : vector<1x128xi1> to vector<1x128xi1>
    %230 = vector.broadcast %229 : vector<1x128xi1> to vector<2x128xi1>
    %231 = vector.broadcast %cst_66 : f32 to vector<2x128xf32>
    %232 = arith.select %230, %218, %231 : vector<2x128xi1>, vector<2x128xf32>
    %233 = vector.extract_strided_slice %202 {offsets = [0, 2], sizes = [2, 128], strides = [1, 1]} : vector<2x132xf32> to vector<2x128xf32>
    %c0_i32_67 = arith.constant 0 : i32
    %234 = vector.broadcast %c0_i32_67 : i32 to vector<1x128xi32>
    %235 = arith.addi %18, %234 : vector<1x128xi32>
    %c0_i32_68 = arith.constant 0 : i32
    %236 = vector.broadcast %c0_i32_68 : i32 to vector<1x128xi32>
    %237 = arith.cmpi sge, %235, %236 : vector<1x128xi32>
    %238 = arith.andi %20, %237 : vector<1x128xi1>
    %c0_i32_69 = arith.constant 0 : i32
    %239 = vector.broadcast %c0_i32_69 : i32 to vector<1x128xi32>
    %240 = arith.addi %18, %239 : vector<1x128xi32>
    %c16_i32_70 = arith.constant 16 : i32
    %241 = vector.broadcast %c16_i32_70 : i32 to vector<1x128xi32>
    %242 = arith.cmpi slt, %240, %241 : vector<1x128xi32>
    %243 = arith.andi %238, %242 : vector<1x128xi1>
    %cst_71 = arith.constant 0.000000e+00 : f32
    %244 = vector.shape_cast %243 : vector<1x128xi1> to vector<1x128xi1>
    %245 = vector.broadcast %244 : vector<1x128xi1> to vector<2x128xi1>
    %246 = vector.broadcast %cst_71 : f32 to vector<2x128xf32>
    %247 = arith.select %245, %233, %246 : vector<2x128xi1>, vector<2x128xf32>
    %248 = vector.extract_strided_slice %202 {offsets = [0, 3], sizes = [2, 128], strides = [1, 1]} : vector<2x132xf32> to vector<2x128xf32>
    %c1_i32_72 = arith.constant 1 : i32
    %249 = vector.broadcast %c1_i32_72 : i32 to vector<1x128xi32>
    %250 = arith.addi %18, %249 : vector<1x128xi32>
    %c0_i32_73 = arith.constant 0 : i32
    %251 = vector.broadcast %c0_i32_73 : i32 to vector<1x128xi32>
    %252 = arith.cmpi sge, %250, %251 : vector<1x128xi32>
    %253 = arith.andi %20, %252 : vector<1x128xi1>
    %c1_i32_74 = arith.constant 1 : i32
    %254 = vector.broadcast %c1_i32_74 : i32 to vector<1x128xi32>
    %255 = arith.addi %18, %254 : vector<1x128xi32>
    %c16_i32_75 = arith.constant 16 : i32
    %256 = vector.broadcast %c16_i32_75 : i32 to vector<1x128xi32>
    %257 = arith.cmpi slt, %255, %256 : vector<1x128xi32>
    %258 = arith.andi %253, %257 : vector<1x128xi1>
    %cst_76 = arith.constant 0.000000e+00 : f32
    %259 = vector.shape_cast %258 : vector<1x128xi1> to vector<1x128xi1>
    %260 = vector.broadcast %259 : vector<1x128xi1> to vector<2x128xi1>
    %261 = vector.broadcast %cst_76 : f32 to vector<2x128xf32>
    %262 = arith.select %260, %248, %261 : vector<2x128xi1>, vector<2x128xf32>
    %263 = vector.extract_strided_slice %202 {offsets = [0, 4], sizes = [2, 128], strides = [1, 1]} : vector<2x132xf32> to vector<2x128xf32>
    %c2_i32 = arith.constant 2 : i32
    %264 = vector.broadcast %c2_i32 : i32 to vector<1x128xi32>
    %265 = arith.addi %18, %264 : vector<1x128xi32>
    %c0_i32_77 = arith.constant 0 : i32
    %266 = vector.broadcast %c0_i32_77 : i32 to vector<1x128xi32>
    %267 = arith.cmpi sge, %265, %266 : vector<1x128xi32>
    %268 = arith.andi %20, %267 : vector<1x128xi1>
    %c2_i32_78 = arith.constant 2 : i32
    %269 = vector.broadcast %c2_i32_78 : i32 to vector<1x128xi32>
    %270 = arith.addi %18, %269 : vector<1x128xi32>
    %c16_i32_79 = arith.constant 16 : i32
    %271 = vector.broadcast %c16_i32_79 : i32 to vector<1x128xi32>
    %272 = arith.cmpi slt, %270, %271 : vector<1x128xi32>
    %273 = arith.andi %268, %272 : vector<1x128xi1>
    %cst_80 = arith.constant 0.000000e+00 : f32
    %274 = vector.shape_cast %273 : vector<1x128xi1> to vector<1x128xi1>
    %275 = vector.broadcast %274 : vector<1x128xi1> to vector<2x128xi1>
    %276 = vector.broadcast %cst_80 : f32 to vector<2x128xf32>
    %277 = arith.select %275, %263, %276 : vector<2x128xi1>, vector<2x128xf32>
    %278 = tpu.concatenate %217, %232, %247, %262, %277 in 0 : vector<2x128xf32>, vector<2x128xf32>, vector<2x128xf32>, vector<2x128xf32>, vector<2x128xf32> -> vector<10x128xf32>
    %c0_81 = arith.constant 0 : index
    %c0_82 = arith.constant 0 : index
    %279 = vector.load %arg4[%c0_81, %c0_82] : memref<2x10xbf16, #tpu.memory_space<vmem>>, vector<2x10xbf16>
    %280 = arith.truncf %278 : vector<10x128xf32> to vector<10x128xbf16>
    %cst_83 = arith.constant dense<0.000000e+00> : vector<2x128xf32>
    %281 = tpu.matmul %279, %280, %cst_83 {dimension_numbers = #tpu.dot_dimension_numbers<[1], [0], [0], [1], [0, 0, 1, 1], [], []>} : vector<2x10xbf16>, vector<10x128xbf16>, vector<2x128xf32> -> vector<2x128xf32>
    %282 = vector.extract_strided_slice %1 {offsets = [0, 3], sizes = [2, 1], strides = [1, 1]} : vector<8x10xf32> to vector<2x1xf32>
    %283 = vector.broadcast %282 : vector<2x1xf32> to vector<2x128xf32>
    %284 = arith.addf %281, %283 : vector<2x128xf32>
    %285 = tpu.concatenate %83, %170, %284, %86 in 0 : vector<2x128xf32>, vector<2x128xf32>, vector<2x128xf32>, vector<2x128xf32> -> vector<8x128xf32>
    %286 = vector.extract_strided_slice %1 {offsets = [0, 8], sizes = [8, 1], strides = [1, 1]} : vector<8x10xf32> to vector<8x1xf32>
    %287 = vector.extract_strided_slice %1 {offsets = [0, 9], sizes = [8, 1], strides = [1, 1]} : vector<8x10xf32> to vector<8x1xf32>
    %288 = vector.broadcast %22 : vector<1x128xf32> to vector<8x128xf32>
    %289 = arith.mulf %285, %288 : vector<8x128xf32>
    %cst_84 = arith.constant dense<0.000000e+00> : vector<8xf32>
    %290 = vector.multi_reduction <add>, %289, %cst_84 [1] : vector<8x128xf32> to vector<8xf32>
    %291 = vector.shape_cast %290 : vector<8xf32> to vector<8x1xf32>
    %cst_85 = arith.constant 3.125000e-02 : f32
    %292 = vector.broadcast %cst_85 : f32 to vector<8x1xf32>
    %293 = arith.mulf %291, %292 : vector<8x1xf32>
    %294 = vector.broadcast %293 : vector<8x1xf32> to vector<8x128xf32>
    %295 = arith.subf %285, %294 : vector<8x128xf32>
    %296 = vector.broadcast %22 : vector<1x128xf32> to vector<8x128xf32>
    %297 = arith.mulf %295, %296 : vector<8x128xf32>
    %298 = arith.mulf %297, %297 : vector<8x128xf32>
    %cst_86 = arith.constant dense<0.000000e+00> : vector<8xf32>
    %299 = vector.multi_reduction <add>, %298, %cst_86 [1] : vector<8x128xf32> to vector<8xf32>
    %300 = vector.shape_cast %299 : vector<8xf32> to vector<8x1xf32>
    %cst_87 = arith.constant 3.125000e-02 : f32
    %301 = vector.broadcast %cst_87 : f32 to vector<8x1xf32>
    %302 = arith.mulf %300, %301 : vector<8x1xf32>
    %303 = vector.broadcast %293 : vector<8x1xf32> to vector<8x128xf32>
    %304 = arith.subf %285, %303 : vector<8x128xf32>
    %305 = vector.broadcast %286 : vector<8x1xf32> to vector<8x128xf32>
    %306 = arith.mulf %305, %304 : vector<8x128xf32>
    %cst_88 = arith.constant 9.99999974E-6 : f32
    %307 = vector.broadcast %cst_88 : f32 to vector<8x1xf32>
    %308 = arith.addf %302, %307 : vector<8x1xf32>
    %309 = math.rsqrt %308 : vector<8x1xf32>
    %310 = vector.broadcast %309 : vector<8x1xf32> to vector<8x128xf32>
    %311 = arith.mulf %306, %310 : vector<8x128xf32>
    %312 = vector.broadcast %287 : vector<8x1xf32> to vector<8x128xf32>
    %313 = arith.addf %311, %312 : vector<8x128xf32>
    %cst_89 = arith.constant 0.000000e+00 : f32
    %314 = vector.broadcast %cst_89 : f32 to vector<8x128xf32>
    %315 = arith.maximumf %313, %314 : vector<8x128xf32>
    %c0_90 = arith.constant 0 : index
    %c0_91 = arith.constant 0 : index
    %316 = vector.load %arg6[%c0_90, %c0_91] : memref<8x128xf32, #tpu.memory_space<vmem>>, vector<8x128xf32>
    tpu.vector_store %arg6[%c0_90, %c0_91], %315 {strides = array<i32>} : memref<8x128xf32, #tpu.memory_space<vmem>>, vector<8x128xf32>,
    return
  }
}

</mosaic_0001>

<bundles_post_ra>
// kernel: tpu_custom_call.1
= control target key start
LH: loop header
LB: loop body
LE: loop exit
PB: predicated region body
PF: predicated region fallthrough
CT: control target
= control target key end

     0   :  { %11 = vsyncpa [#allocation3], 0  ;;  %s912_s0 = inlined_call_operand.hbm [shape: f32[4,128], index: 0, kind: input, shape index: {}]   ;;  %s913_s1 = inlined_call_operand.vmem [shape: bf16[4,4], index: 1, kind: input, shape index: {}]   ;;  %s914_s2 = inlined_call_operand.vmem [shape: bf16[4,12], index: 2, kind: input, shape index: {}]   ;;  %s915_s3 = inlined_call_operand.vmem [shape: bf16[2,6], index: 3, kind: input, shape index: {}]   ;;  %s916_s4 = inlined_call_operand.vmem [shape: bf16[2,10], index: 4, kind: input, shape index: {}]   ;;  %s917_s5 = inlined_call_operand.vmem [shape: f32[8,10], index: 5, kind: input, shape index: {}]   ;;  %s918_s6 = inlined_call_operand.hbm [shape: f32[8,128], index: 6, kind: output, shape index: {}]  }
   0x1   :  { %12 = vsyncpa [#allocation4], 0  ;;  %s694_s21 = smov [#allocation2]   ;;  %s646_s25 = scalar_lea.hbm %s912_s0, 64 }
   0x2   :  { %s19_s22 = sshll.u32 %s694_s21, 4  ;;  %p647_p0 = scmp.ne.s32.totalorder %s912_s0, %s646_s25  ;;  %s20_s22 = int_to_ptr.vmem [resolvable:$true] %s19_s22 }
   0x3   :  { %p650_p1 = scmp.lt.u32.totalorder %s646_s25, %s912_s0 }
   0x5   :  { %p652_p2 = pnand %p650_p1, %p647_p0 }
   0x7   :  { %655 = shalt.err (!%p652_p2)
}
   0x8   :  { %s656_s30 = scalar_lea.vmem %s20_s22, 64  ;;  %p661_p4 = scmp.lt.s32.totalorder %s20_s22, %s20_s22 }
   0x9   :  { %p657_p3 = scmp.ne.s32.totalorder %s20_s22, %s656_s30  ;;  %p662_p5 = scmp.lt.s32.totalorder %s656_s30, %s656_s30 }
   0xb   :  { %p663_p6 = por %p662_p5, %p661_p4 }
   0xd   :  { %p664_p7 = pnand %p663_p6, %p657_p3 }
   0xf   :  { %667 = shalt.err (!%p664_p7)
}
  0x10   :  { %22 = dma.hbm_to_vmem [thread:$0]  %s912_s0, 64, %s20_s22, [#allocation3]  }
  0x11   :  { %690 = dma.done.wait [#allocation3], 64  }
  0x12   :  { %691 = vsyncadd [#allocation3], 4294967232  ;;  %v695_v0 = vmov 0.0   ;;  %vm696_vm0 = vmmov 0   ;;  %v697_v1 = vmov 0   ;;  %vm67_vm1 = vcmask 1041408  }
  0x13   :  { %545 = vmatprep.subr.bf16.mxu0 %v695_v0  ;;  %547 = vmatprep.mubr.msk.bf16.mxu0 %vm696_vm0, %v695_v0  ;;  %v37_v2 = vld [vmem:[#allocation2] sm:$0xf]  ;;  %s698_s9 = smov 1   ;;  %v56_v5 = vld [vmem:[%s913_s1] sm:$0x3]  ;;  %vm63_vm2 = vcmask 31744   ;;  %v39_v12 = vlaneseq }
  0x14   :  { %599 = vset.pattern.permute.xlu1 %v697_v1  ;;  %551 = vmatprep.subr.bf16.mxu1 %v695_v0  ;;  %v57_v3 = vpack.c.bf16 %v37_v2, %v37_v2  ;;  %vm115_vm3 = vcmask 7168   ;;  %s699_s11 = smov 126   ;;  %s700_s12 = smov 127   ;;  %v782_v10 = vld [vmem:[%s917_s5] sm:$0xff]  ;;  %v701_v11 = vmov 1   ;;  %vm138_vm6 = vcmask 1039360  }
  0x15   :  { %553 = vmatprep.mubr.msk.bf16.mxu1 %vm696_vm0, %v695_v0  ;;  %112 = vrot.lane.b32.xlu0 %v37_v2, %s698_s9  ;;  %v786_v16 = vand.u32 127, %v39_v12  ;;  %vm153_vm8 = vcmask 1031168   ;;  %vm160_vm11 = vcmask 1043456   ;;  %vm172_vm12 = vcmask 1045504   ;;  %v162_v38 = vld [vmem:[%s914_s2] sm:$0x3] }
  0x16   :  { %v69_v4 = vsel %vm67_vm1, %v57_v3, 0  ;;  %600 = vset.pattern.permute.xlu0 %v701_v11  ;;  %vm168_vm13 = vcmask 97280   ;;  %vm217_vm14 = vcmask 1043458   ;;  %v702_v44 = vmov 4   ;;  %s706_s2 = smov 2   ;;  %s708_s15 = smov 125  }
  0x17   :  { %546 = vmatpush3.bf16.msra.mxu0 %v69_v4  ;;  %v789_v18 = vand.u32 15, %v786_v16  ;;  %vm53_vm4 = vcmp.lt.s32.totalorder %v786_v16, 32  ;;  %v703_v51 = vmov 5   ;;  %v704_v52 = vmov 7   ;;  %s710_s16 = smov 124  }
  0x18   :  { %557 = vmatprep.subr.bf16.mxu0 %v695_v0  ;;  %v825_v40 = vsel %vm53_vm4, 1.0, %v695_v0  ;;  %v705_v61 = vmov 6   ;;  %vm364_vm15 = vcmask 15360  }
  0x19   :  { %v118_v19 = vadd.s32 4294967295, %v789_v18  ;;  %v142_v20 = vadd.s32 1, %v789_v18 }
  0x1a   :  { %548 = vmatmul.mubr.msk.bf16.vlgmr.msra.gmra.mrb[0].mxu0 %vm63_vm2, %v56_v5  ;;  %vm286_vm2 = vcmask 48128  }
  0x1b   :  { %559 = vmatprep.mubr.msk.bf16.mxu0 %vm696_vm0, %v695_v0  ;;  %vm119_vm5 = vcmp.ge.s32.totalorder %v118_v19, 0  ;;  %vm145_vm7 = vcmp.lt.s32.totalorder %v142_v20, 16 }
  0x1c   :  { %vm796_vm9 = vmand %vm53_vm4, %vm119_vm5 }
  0x1d   :  { %vm805_vm10 = vmand %vm53_vm4, %vm145_vm7 }
  0x87   :  { %v113_v6 = vpop.permute.xlu0 %112 }
  0x88   :  { %v116_v7 = vsel %vm115_vm3, 0.0, %v113_v6  ;;  %v117_v8 = vsel %vm115_vm3, %v113_v6, 0.0 }
  0x89   :  { %v589_v9 = vpack.i.bf16 %v117_v8, %v116_v7  ;;  %v125_v33 = vsel %vm796_vm9, %v116_v7, 0.0 }
  0x8b   :  { %595 = vrot.lane.b32.xlu1 %v589_v9, %s699_s11  ;;  %590 = vrot.lane.b32.xlu0 %v589_v9, %s700_s12 }
  0x8f   :  { %60 = vperm.xlu1 %599, %v782_v10   ;;  %165 = vperm.xlu0 %600, %v782_v10  }
  0x93   :  { %601 = vset.pattern.permute.xlu1 %v702_v44  ;;  %602 = vset.pattern.permute.xlu0 %v705_v61  ;;  %v280_v61 = vld [vmem:[%s915_s3] sm:$0x1] }
  0xed   :  { %v105_v13 = vpop.f32.mrb[0].mxu0 }
  0xee   :  { %v549_v14 = vpop.f32.mrb[1].mxu0 }
  0xef   :  { %v108_v15 = vpop.f32.mrb[2].mxu0 }
  0xf0   :  { %v550_v17 = vpop.f32.mrb[3].mxu0 }
  0xfd   :  { %v596_v21 = vpop.permute.xlu1 %595  ;;  %v591_v22 = vpop.permute.xlu0 %590 }
  0xfe   :  { %v598_v23 = vunpack.i.h.bf16 %v596_v21  ;;  %v597_v24 = vunpack.i.l.bf16 %v596_v21  ;;  %v593_v25 = vunpack.i.h.bf16 %v591_v22  ;;  %v592_v26 = vunpack.i.l.bf16 %v591_v22 }
 0x100   :  { %v139_v28 = vsel %vm138_vm6, %v592_v26, %v593_v25  ;;  %v154_v31 = vsel %vm153_vm8, %v597_v24, %v598_v23 }
 0x101   :  { %v141_v29 = vsel %vm53_vm4, %v139_v28, 0.0  ;;  %v156_v34 = vsel %vm805_vm10, %v154_v31, 0.0 }
 0x102   :  { %v158_v32 = vrot.slane %v141_v29, 4 }
 0x104   :  { %v161_v35 = vsel %vm160_vm11, %v125_v33, %v158_v32 }
 0x105   :  { %v163_v36 = vpack.c.bf16 %v156_v34, %v161_v35  ;;  %v707_v35 = vmov 2  }
 0x107   :  { %v174_v37 = vsel %vm172_vm12, %v163_v36, 0 }
 0x108   :  { %552 = vmatpush3.bf16.msra.mxu1 %v174_v37 }
 0x109   :  { %563 = vmatprep.subr.bf16.mxu1 %v695_v0 }
 0x10b   :  { %554 = vmatmul.mubr.msk.bf16.vlgmr.msra.gmra.mrb[0].mxu1 %vm168_vm13, %v162_v38 }
 0x10c   :  { %565 = vmatprep.mubr.msk.bf16.mxu1 %vm696_vm0, %v695_v0  ;;  %vm290_vm0 = vcmask 1042432  }
 0x10e   :  { %v61_v39 = vpop.permute.xlu1 %60  ;;  %v166_v53 = vpop.permute.xlu0 %165 }
 0x10f   :  { %v827_v41 = vadd.f32 %v105_v13, %v61_v39 }
 0x111   :  { %v216_v42 = vmul.f32 %v825_v40, %v827_v41 }
 0x113   :  { %v218_v43 = vsel %vm217_vm14, %v216_v42, 0.0 }
 0x114   :  { %219 = vadd.xlane.f32.xlu1 %v218_v43 }
 0x1a1   :  { %v220_v45 = vpop.xlane.xlu1 %219 }
 0x1a2   :  { %v221_v46 = vmul.f32 0.03125, %v220_v45 }
 0x1a4   :  { %v222_v47 = vsub.f32 %v827_v41, %v221_v46 }
 0x1a6   :  { %v223_v48 = vmul.f32 %v825_v40, %v222_v47  ;;  %v234_v2 = vrot.slane %v222_v47, 2 }
 0x1a8   :  { %v224_v49 = vmul.f32 %v223_v48, %v223_v48 }
 0x1aa   :  { %v225_v50 = vsel %vm217_vm14, %v224_v49, 0.0 }
 0x1ab   :  { %226 = vadd.xlane.f32.xlu1 %v225_v50 }
 0x1bc   :  { %230 = vperm.xlu1 %601, %v782_v10  }
 0x1c0   :  { %603 = vset.pattern.permute.xlu1 %v703_v51  ;;  %v709_v51 = vmov 3  }
 0x1c1   :  { %244 = vperm.xlu1 %603, %v782_v10  }
 0x1c5   :  { %604 = vset.pattern.permute.xlu1 %v704_v52 }
 0x1c6   :  { %355 = vperm.xlu1 %604, %v782_v10  }
 0x1ca   :  { %636 = vset.pattern.permute.xlu1 %v709_v51 }
 0x1de   :  { %v210_v54 = vpop.f32.mrb[0].mxu1 }
 0x1df   :  { %v836_v55 = vadd.f32 %v210_v54, %v166_v53  ;;  %v555_v56 = vpop.f32.mrb[1].mxu1 }
 0x1e0   :  { %v213_v57 = vpop.f32.mrb[2].mxu1 }
 0x1e1   :  { %v556_v58 = vpop.f32.mrb[3].mxu1  ;;  %v334_v59 = vmul.f32 %v825_v40, %v836_v55 }
 0x1e3   :  { %v335_v60 = vsel %vm67_vm1, %v334_v59, 0.0 }
 0x1e4   :  { %336 = vadd.xlane.f32.xlu0 %v335_v60 }
 0x238   :  { %v227_v62 = vpop.xlane.xlu1 %226 }
 0x239   :  { %v228_v63 = vmul.f32 0.03125, %v227_v62  ;;  %v367_v62 = vadd.s32 4294967294, %v789_v18 }
 0x23b   :  { %v237_v0 = vadd.f32 1e-05, %v228_v63  ;;  %vm368_vm5 = vcmp.ge.s32.totalorder %v367_v62, 0 }
 0x23c   :  { %v231_v1 = vpop.permute.xlu1 %230  ;;  %vm369_vm7 = vmand %vm53_vm4, %vm368_vm5 }
 0x23d   :  { %640 = vrsqrt.f32 %v237_v0  ;;  %v236_v5 = vmul.f32 %v234_v2, %v231_v1 }
 0x240   :  { %v245_v6 = vpop.permute.xlu1 %244 }
 0x245   :  { %v356_v23 = vpop.permute.xlu1 %355 }
 0x247   :  { %v641_v3 = vpop.eup %640 }
 0x248   :  { %v240_v4 = vrot.slane %v641_v3, 2 }
 0x24a   :  { %v242_v7 = vmul.f32 %v240_v4, %v236_v5  ;;  %v399_v5 = vadd.s32 2, %v789_v18 }
 0x24c   :  { %v247_v8 = vadd.f32 %v245_v6, %v242_v7  ;;  %vm402_vm13 = vcmp.lt.s32.totalorder %v399_v5, 16 }
 0x24e   :  { %v248_v9 = vmax.f32 %v247_v8, 0.0 }
 0x250   :  { %250 = vrot.lane.b32.xlu1 %v248_v9, %s698_s9 }
 0x271   :  { %v337_v11 = vpop.xlane.xlu0 %336 }
 0x272   :  { %v338_v12 = vmul.f32 0.03125, %v337_v11 }
 0x274   :  { %v339_v13 = vsub.f32 %v836_v55, %v338_v12 }
 0x276   :  { %v340_v14 = vmul.f32 %v825_v40, %v339_v13 }
 0x278   :  { %v341_v15 = vmul.f32 %v340_v14, %v340_v14 }
 0x27a   :  { %v342_v17 = vsel %vm67_vm1, %v341_v15, 0.0 }
 0x27b   :  { %343 = vadd.xlane.f32.xlu0 %v342_v17 }
 0x291   :  { %347 = vperm.xlu0 %602, %v782_v10  }
 0x295   :  { %635 = vset.pattern.permute.xlu0 %v707_v35 }
 0x2c2   :  { %v251_v28 = vpop.permute.xlu1 %250 }
 0x2c3   :  { %v253_v32 = vsel %vm115_vm3, 0.0, %v251_v28  ;;  %v254_v33 = vsel %vm115_vm3, %v251_v28, 0.0  ;;  %vm395_vm3 = vcmask 1022976  }
 0x2c4   :  { %v605_v34 = vpack.i.bf16 %v254_v33, %v253_v32  ;;  %v255_v54 = vsel %vm796_vm9, %v253_v32, 0.0 }
 0x308   :  { %v344_v19 = vpop.xlane.xlu0 %343 }
 0x309   :  { %v345_v20 = vmul.f32 0.03125, %v344_v19 }
 0x30b   :  { %v351_v21 = vadd.f32 1e-05, %v345_v20 }
 0x30d   :  { %642 = vrsqrt.f32 %v351_v21 }
 0x310   :  { %v348_v22 = vpop.permute.xlu0 %347 }
 0x311   :  { %v350_v24 = vmul.f32 %v348_v22, %v339_v13 }
 0x317   :  { %v643_v25 = vpop.eup %642 }
 0x318   :  { %v353_v26 = vmul.f32 %v643_v25, %v350_v24 }
 0x31a   :  { %v358_v29 = vadd.f32 %v356_v23, %v353_v26 }
 0x31c   :  { %v359_v31 = vmax.f32 %v358_v29, 0.0 }
 0x31e   :  { %361 = vrot.lane.b32.xlu1 %v359_v31, %s706_s2  ;;  %v426_v31 = vld [vmem:[%s916_s4] sm:$0x1]  ;;  %s713_s4 = smov [#allocation5]  }
 0x31f   :  { %s523_s20 = sshll.u32 %s713_s4, 4  ;;  %s524_s20 = int_to_ptr.vmem [resolvable:$true] %s523_s20 }
 0x320   :  { %s668_s21 = scalar_lea.vmem %s524_s20, 128  ;;  %p673_p9 = scmp.lt.s32.totalorder %s524_s20, %s524_s20 }
 0x321   :  { %p669_p8 = scmp.ne.s32.totalorder %s524_s20, %s668_s21  ;;  %p674_p10 = scmp.lt.s32.totalorder %s668_s21, %s668_s21 }
 0x322   :  { %606 = vrot.lane.b32.xlu1 %v605_v34, %s700_s12 }
 0x323   :  { %p675_p11 = por %p674_p10, %p673_p9 }
 0x325   :  { %p676_p12 = pnand %p675_p11, %p669_p8 }
 0x326   :  { %611 = vrot.lane.b32.xlu1 %v605_v34, %s699_s11 }
 0x390   :  { %v362_v36 = vpop.permute.xlu1 %361 }
 0x391   :  { %v850_v37 = vsel %vm364_vm15, 0.0, %v362_v36  ;;  %v366_v38 = vsel %vm364_vm15, %v362_v36, 0.0 }
 0x392   :  { %v625_v39 = vpack.i.bf16 %v366_v38, %v850_v37  ;;  %v374_v27 = vsel %vm369_vm7, %v850_v37, 0.0 }
 0x394   :  { %626 = vrot.lane.b32.xlu0 %v625_v39, %s708_s15  ;;  %616 = vrot.lane.b32.xlu1 %v625_v39, %s700_s12  ;;  %v607_v42 = vpop.permute.xlu1 %606 }
 0x395   :  { %v609_v43 = vunpack.i.h.bf16 %v607_v42  ;;  %v608_v44 = vunpack.i.l.bf16 %v607_v42 }
 0x397   :  { %v262_v45 = vsel %vm138_vm6, %v608_v44, %v609_v43 }
 0x398   :  { %v264_v46 = vsel %vm53_vm4, %v262_v45, 0.0  ;;  %621 = vrot.lane.b32.xlu1 %v625_v39, %s699_s11  ;;  %v612_v47 = vpop.permute.xlu1 %611  ;;  %283 = vperm.xlu0 %635, %v782_v10  }
 0x399   :  { %v614_v48 = vunpack.i.h.bf16 %v612_v47  ;;  %v613_v49 = vunpack.i.l.bf16 %v612_v47  ;;  %v273_v50 = vrot.slane %v264_v46, 6  ;;  %v487_v47 = vrot.slane %v836_v55, 4 }
 0x39b   :  { %v269_v52 = vsel %vm153_vm8, %v613_v49, %v614_v48  ;;  %v278_v57 = vsel %vm67_vm1, %v255_v54, %v273_v50 }
 0x39c   :  { %v271_v53 = vsel %vm805_vm10, %v269_v52, 0.0  ;;  %631 = vrot.lane.b32.xlu1 %v625_v39, %s710_s16  ;;  %v711_v52 = vmov 8  }
 0x39d   :  { %v276_v56 = vrot.slane %v271_v53, 4  ;;  %637 = vset.pattern.permute.xlu0 %v711_v52  ;;  %v712_v53 = vmov 9  }
 0x39f   :  { %v279_v58 = vsel %vm160_vm11, %v278_v57, %v276_v56 }
 0x3a0   :  { %v281_v59 = vpack.c.bf16 %v279_v58, %v279_v58  ;;  %429 = vperm.xlu1 %636, %v782_v10  }
 0x3a2   :  { %v292_v60 = vsel %vm290_vm0, %v281_v59, 0 }
 0x3a3   :  { %558 = vmatpush3.bf16.msra.mxu0 %v292_v60 }
 0x3a4   :  { %638 = vset.pattern.permute.xlu1 %v712_v53 }
 0x3a6   :  { %560 = vmatmul.mubr.msk.bf16.vlgmr.msra.gmra.mrb[4].mxu0 %vm286_vm2, %v280_v61 }
 0x406   :  { %v627_v63 = vpop.permute.xlu0 %626  ;;  %v617_v0 = vpop.permute.xlu1 %616 }
 0x407   :  { %v629_v1 = vunpack.i.h.bf16 %v627_v63  ;;  %v628_v2 = vunpack.i.l.bf16 %v627_v63  ;;  %v619_v3 = vunpack.i.h.bf16 %v617_v0  ;;  %v618_v4 = vunpack.i.l.bf16 %v617_v0 }
 0x409   :  { %v381_v6 = vsel %vm138_vm6, %v618_v4, %v619_v3  ;;  %v396_v7 = vsel %vm395_vm3, %v628_v2, %v629_v1  ;;  %vm410_vm6 = vcmask 1014784  }
 0x40a   :  { %v383_v8 = vsel %vm796_vm9, %v381_v6, 0.0  ;;  %v622_v9 = vpop.permute.xlu1 %621  ;;  %v398_v14 = vsel %vm805_vm10, %v396_v7, 0.0  ;;  %vm403_vm9 = vmand %vm53_vm4, %vm402_vm13  ;;  %vm432_vm10 = vcmask 80896  }
 0x40b   :  { %v624_v11 = vunpack.i.h.bf16 %v622_v9  ;;  %v623_v12 = vunpack.i.l.bf16 %v622_v9  ;;  %v415_v13 = vrot.slane %v383_v8, 6  ;;  %v421_v22 = vrot.slane %v398_v14, 2 }
 0x40d   :  { %v388_v18 = vsel %vm153_vm8, %v623_v12, %v624_v11  ;;  %v423_v23 = vsel %vm67_vm1, %v374_v27, %v415_v13  ;;  %vm436_vm8 = vcmask 1044480  }
 0x40e   :  { %v390_v15 = vsel %vm53_vm4, %v388_v18, 0.0  ;;  %v632_v17 = vpop.permute.xlu1 %631 }
 0x40f   :  { %v418_v19 = vrot.slane %v390_v15, 4  ;;  %v634_v20 = vunpack.i.h.bf16 %v632_v17  ;;  %v633_v21 = vunpack.i.l.bf16 %v632_v17 }
 0x411   :  { %v411_v30 = vsel %vm410_vm6, %v633_v21, %v634_v20  ;;  %v424_v24 = vsel %vm160_vm11, %v423_v23, %v418_v19 }
 0x412   :  { %v413_v25 = vsel %vm403_vm9, %v411_v30, 0.0  ;;  %v425_v26 = vsel %vm172_vm12, %v424_v24, %v421_v22 }
 0x413   :  { %v427_v28 = vpack.c.bf16 %v413_v25, %v425_v26 }
 0x415   :  { %v438_v29 = vsel %vm436_vm8, %v427_v28, 0 }
 0x416   :  { %564 = vmatpush3.bf16.msra.mxu1 %v438_v29 }
 0x417   :  { %v284_v35 = vpop.permute.xlu0 %283 }
 0x419   :  { %566 = vmatmul.mubr.msk.bf16.vlgmr.msra.gmra.mrb[4].mxu1 %vm432_vm10, %v426_v31 }
 0x41f   :  { %v430_v37 = vpop.permute.xlu1 %429 }
 0x479   :  { %v328_v16 = vpop.f32.mrb[4].mxu0 }
 0x47a   :  { %v561_v32 = vpop.f32.mrb[5].mxu0  ;;  %v329_v36 = vadd.f32 %v328_v16, %v284_v35 }
 0x47b   :  { %v331_v33 = vpop.f32.mrb[6].mxu0 }
 0x47c   :  { %v562_v34 = vpop.f32.mrb[7].mxu0  ;;  %v481_v38 = vrot.slane %v329_v36, 6 }
 0x47e   :  { %v489_v48 = vsel %vm67_vm1, %v827_v41, %v481_v38 }
 0x4ec   :  { %v474_v39 = vpop.f32.mrb[4].mxu1 }
 0x4ed   :  { %v475_v42 = vadd.f32 %v474_v39, %v430_v37  ;;  %v567_v43 = vpop.f32.mrb[5].mxu1 }
 0x4ee   :  { %v477_v44 = vpop.f32.mrb[6].mxu1 }
 0x4ef   :  { %v484_v45 = vrot.slane %v475_v42, 4  ;;  %v568_v46 = vpop.f32.mrb[7].mxu1 }
 0x4f1   :  { %v490_v49 = vsel %vm160_vm11, %v489_v48, %v484_v45 }
 0x4f2   :  { %v491_v50 = vsel %vm172_vm12, %v490_v49, %v487_v47 }
 0x4f3   :  { %v492_v51 = vmul.f32 %v825_v40, %v491_v50 }
 0x4f5   :  { %493 = vadd.xlane.f32.xlu1 %v492_v51 }
 0x506   :  { %511 = vperm.xlu1 %638, %v782_v10  }
 0x582   :  { %v494_v54 = vpop.xlane.xlu1 %493 }
 0x583   :  { %v495_v56 = vmul.f32 0.03125, %v494_v54 }
 0x585   :  { %v496_v57 = vsub.f32 %v491_v50, %v495_v56 }
 0x586   :  { %v512_v0 = vpop.permute.xlu1 %511 }
 0x587   :  { %v497_v55 = vmul.f32 %v825_v40, %v496_v57 }
 0x589   :  { %v498_v58 = vmul.f32 %v497_v55, %v497_v55 }
 0x58b   :  { %499 = vadd.xlane.f32.xlu0 %v498_v58 }
 0x5a1   :  { %503 = vperm.xlu0 %637, %v782_v10  }
 0x5a5   :  { %639 = vset.pattern.permute.xlu0 %v712_v53 }
 0x618   :  { %v500_v41 = vpop.xlane.xlu0 %499 }
 0x619   :  { %v501_v59 = vmul.f32 0.03125, %v500_v41 }
 0x61b   :  { %v507_v60 = vadd.f32 1e-05, %v501_v59 }
 0x61d   :  { %644 = vrsqrt.f32 %v507_v60 }
 0x620   :  { %v504_v61 = vpop.permute.xlu0 %503 }
 0x621   :  { %v506_v62 = vmul.f32 %v504_v61, %v496_v57 }
 0x627   :  { %v645_v63 = vpop.eup %644 }
 0x628   :  { %v509_v1 = vmul.f32 %v645_v63, %v506_v62 }
 0x62a   :  { %v514_v2 = vadd.f32 %v512_v0, %v509_v1 }
 0x62c   :  { %v515_v3 = vmax.f32 %v514_v2, 0.0 }
 0x62e   :  { %516 = vst [vmem:[#allocation5] sm:$0xff] %v515_v3 }
 0x62f   :  { %679 = shalt.err (!%p676_p12)
}
 0x630   :  { %s680_s24 = scalar_lea.hbm %s918_s6, 128 }
 0x631   :  { %p681_p13 = scmp.ne.s32.totalorder %s918_s6, %s680_s24  ;;  %p684_p0 = scmp.lt.u32.totalorder %s680_s24, %s918_s6 }
 0x633   :  { %p686_p1 = pnand %p684_p0, %p681_p13 }
 0x635   :  { %689 = shalt.err (!%p686_p1)
}
 0x636   :  { %526 = dma.vmem_to_hbm [thread:$0]  %s524_s20, 128, %s918_s6, [#allocation4]  }
 0x637   :  { %692 = dma.done.wait [#allocation4], 128  }
 0x638   :  { %693 = vsyncadd [#allocation4], 4294967168 }
 0x639   :  { %530 = vsyncpa [#allocation3], 1 }
 0x63a   :  { %531 = vsyncpa [#allocation4], 1 }

</bundles_post_ra>
